<compile_context>
chip_gen: v7x
topology: tpu7x:2x2x1
jax: 0.10.0
libtpu: 0.0.40
codegen_flags: <defaults>
</compile_context>

<pallas_src>
import functools

import jax
import jax.numpy as jnp
from jax.experimental import pallas as pl
from jax.experimental.pallas import tpu as pltpu

INPUT_SIZE = 13     # wine dataset has 13 feature columns (xy[:, 1:])
HIDDEN1 = 10
HIDDEN2 = 5
NUM_CLASSES = 3

# Padded sizes used inside the kernel (zero padding is inert for this MLP).
D_IN_PAD = 16       # 13 -> 16
H1_PAD = 16         # 10 -> 16
H2_PAD = 8          # 5  -> 8

# Layout of the packed parameter slab: (PARAM_ROWS, 128) f32.
W1_ROW = 0          # rows  0:16  hold W1 (13 x 10) zero-padded
W2_ROW = 16         # rows 16:32  hold W2 (10 x 5)  zero-padded
W3_ROW = 32         # rows 32:40  hold W3 (5 x 3)   zero-padded
B_ROW = 40          # row 40 = b1, row 41 = b2, row 42 = b3 (lane-padded with zeros)
PARAM_ROWS = 48
PARAM_LANES = 128


def _round_up(a, m):
    return (a + m - 1) // m * m


def mlp_kernel(x_ref, p_ref, o_ref):
    x = x_ref[...]                                            # (TB, 16) f32

    # Static slices of the VMEM-resident parameter slab (loaded once for the grid).
    w1 = p_ref[W1_ROW:W1_ROW + D_IN_PAD, 0:H1_PAD]            # (16, 16)
    w2 = p_ref[W2_ROW:W2_ROW + H1_PAD, 0:H2_PAD]              # (16, 8)
    w3 = p_ref[W3_ROW:W3_ROW + H2_PAD, 0:NUM_CLASSES]         # (8, 3)
    b1 = p_ref[B_ROW + 0:B_ROW + 1, 0:H1_PAD]                 # (1, 16)
    b2 = p_ref[B_ROW + 1:B_ROW + 2, 0:H2_PAD]                 # (1, 8)
    b3 = p_ref[B_ROW + 2:B_ROW + 3, 0:NUM_CLASSES]            # (1, 3)

    # fc1 + relu1
    h1 = jnp.maximum(
        jnp.dot(x, w1, preferred_element_type=jnp.float32) + b1, 0.0)
    # fc2 + relu2
    h2 = jnp.maximum(
        jnp.dot(h1, w2, preferred_element_type=jnp.float32) + b2, 0.0)
    # fc3 (logits)
    out = jnp.dot(h2, w3, preferred_element_type=jnp.float32) + b3
    o_ref[...] = out.astype(o_ref.dtype)


@functools.partial(jax.jit, static_argnames=("block_batch",))
def neural_net_forward(x, w1, b1, w2, b2, w3, b3, *, block_batch=1024):
    batch = x.shape[0]

    # Batch tile: big enough to amortize per-step overhead, clamped for tiny batches,
    # always a multiple of 8 (f32 sublane rule for the block shape).
    tb = min(block_batch, _round_up(batch, 8))
    tb = _round_up(tb, 8)
    batch_pad = _round_up(batch, tb)
    grid = (batch_pad // tb,)

    # Zero-pad x: batch -> batch_pad rows, 13 -> 16 feature lanes.
    x_pad = jnp.pad(
        x.astype(jnp.float32),
        ((0, batch_pad - batch), (0, D_IN_PAD - INPUT_SIZE)),
    )

    # Pack all parameters into one lane-aligned slab (one DMA, VMEM-resident).
    params = jnp.zeros((PARAM_ROWS, PARAM_LANES), jnp.float32)
    params = params.at[W1_ROW:W1_ROW + INPUT_SIZE, 0:HIDDEN1].set(w1)
    params = params.at[W2_ROW:W2_ROW + HIDDEN1, 0:HIDDEN2].set(w2)
    params = params.at[W3_ROW:W3_ROW + HIDDEN2, 0:NUM_CLASSES].set(w3)
    params = params.at[B_ROW + 0, 0:HIDDEN1].set(b1.reshape(-1))
    params = params.at[B_ROW + 1, 0:HIDDEN2].set(b2.reshape(-1))
    params = params.at[B_ROW + 2, 0:NUM_CLASSES].set(b3.reshape(-1))

    flops = 2 * batch_pad * (INPUT_SIZE * HIDDEN1
                             + HIDDEN1 * HIDDEN2
                             + HIDDEN2 * NUM_CLASSES)
    bytes_accessed = (x_pad.size + params.size + batch_pad * NUM_CLASSES) * 4
    cost = pl.CostEstimate(
        flops=flops, transcendentals=0, bytes_accessed=bytes_accessed)

    out_pad = pl.pallas_call(
        mlp_kernel,
        out_shape=jax.ShapeDtypeStruct((batch_pad, NUM_CLASSES), jnp.float32),
        grid=grid,
        in_specs=[
            # Activation tiles pipeline along the batch grid.
            pl.BlockSpec((tb, D_IN_PAD), lambda i: (i, 0)),
            # Parameters: constant block index -> DMA'd once, stays resident.
            pl.BlockSpec((PARAM_ROWS, PARAM_LANES), lambda i: (0, 0)),
        ],
        out_specs=pl.BlockSpec((tb, NUM_CLASSES), lambda i: (i, 0)),
        compiler_params=pltpu.CompilerParams(
            dimension_semantics=("parallel",)),
        cost_estimate=cost,
    )(x_pad, params)

    return out_pad[:batch]


def init_linear(key, fan_in, fan_out):
    # Mimic torch.nn.Linear default init: U(-1/sqrt(fan_in), 1/sqrt(fan_in)).
    kw, kb = jax.random.split(key)
    bound = 1.0 / jnp.sqrt(jnp.float32(fan_in))
    # Store weight as (fan_in, fan_out) so the kernel computes x @ W (== x @ W_torch.T).
    w = jax.random.uniform(kw, (fan_in, fan_out), jnp.float32, -bound, bound)
    b = jax.random.uniform(kb, (1, fan_out), jnp.float32, -bound, bound)
    return w, b


def reference_forward(x, w1, b1, w2, b2, w3, b3):
    h1 = jnp.maximum(x @ w1 + b1, 0.0)
    h2 = jnp.maximum(h1 @ w2 + b2, 0.0)
    return h2 @ w3 + b3


if __name__ == "__main__":
    key = jax.random.PRNGKey(0)
    kx, kx2, k1, k2, k3 = jax.random.split(key, 5)

    w1, b1 = init_linear(k1, INPUT_SIZE, HIDDEN1)
    w2, b2 = init_linear(k2, HIDDEN1, HIDDEN2)
    w3, b3 = init_linear(k3, HIDDEN2, NUM_CLASSES)

    # Small batch (single tile, grid of 1).
    batch = 8
    x = jax.random.normal(kx, (batch, INPUT_SIZE), jnp.float32)
    out = neural_net_forward(x, w1, b1, w2, b2, w3, b3)
    out = jax.block_until_ready(out)
    ref = reference_forward(x, w1, b1, w2, b2, w3, b3)
    assert out.shape == (batch, NUM_CLASSES)
    assert jnp.allclose(out, ref, atol=1e-5, rtol=1e-5)

    # Ragged batch exercising the batch grid + tail padding (300 rows, 128-row tiles).
    batch2 = 300
    x2 = jax.random.normal(kx2, (batch2, INPUT_SIZE), jnp.float32)
    out2 = neural_net_forward(x2, w1, b1, w2, b2, w3, b3, block_batch=128)
    out2 = jax.block_until_ready(out2)
    ref2 = reference_forward(x2, w1, b1, w2, b2, w3, b3)
    assert out2.shape == (batch2, NUM_CLASSES)
    assert jnp.allclose(out2, ref2, atol=1e-5, rtol=1e-5)

    print("KERNEL_OK")
</pallas_src>

<mosaic_0001>
module attributes {stable_mosaic.version = 11 : i64} {
  func.func @mlp_kernel(%arg0: i32, %arg1: memref<8x16xf32, #tpu.memory_space<vmem>>, %arg2: memref<48x128xf32, #tpu.memory_space<vmem>>, %arg3: memref<8x3xf32, #tpu.memory_space<vmem>>) attributes {dimension_semantics = [#tpu.dimension_semantics<parallel>], iteration_bounds = array<i64: 1>, scalar_prefetch = 0 : i64, scratch_operands = 0 : i64, tpu.core_type = #tpu.core_type<tc>, window_params = [{transform_indices = @transform_0, window_bounds = array<i64: 8, 16>}, {pipeline_mode = #tpu.pipeline_mode<synchronous>, transform_indices = @transform_1, window_bounds = array<i64: 48, 128>}, {transform_indices = @transform_2, window_bounds = array<i64: 8, 3>}]} {
    %c0 = arith.constant 0 : index
    %c0_0 = arith.constant 0 : index
    %0 = vector.load %arg1[%c0, %c0_0] : memref<8x16xf32, #tpu.memory_space<vmem>>, vector<8x16xf32>
    %c0_1 = arith.constant 0 : index
    %c0_2 = arith.constant 0 : index
    %1 = vector.load %arg2[%c0_1, %c0_2] : memref<48x128xf32, #tpu.memory_space<vmem>>, vector<16x16xf32>
    %c16 = arith.constant 16 : index
    %c0_3 = arith.constant 0 : index
    %2 = vector.load %arg2[%c16, %c0_3] : memref<48x128xf32, #tpu.memory_space<vmem>>, vector<16x8xf32>
    %c32 = arith.constant 32 : index
    %c0_4 = arith.constant 0 : index
    %3 = vector.load %arg2[%c32, %c0_4] : memref<48x128xf32, #tpu.memory_space<vmem>>, vector<8x3xf32>
    %c40 = arith.constant 40 : index
    %c0_5 = arith.constant 0 : index
    %4 = vector.load %arg2[%c40, %c0_5] : memref<48x128xf32, #tpu.memory_space<vmem>>, vector<1x16xf32>
    %c41 = arith.constant 41 : index
    %c0_6 = arith.constant 0 : index
    %5 = vector.load %arg2[%c41, %c0_6] : memref<48x128xf32, #tpu.memory_space<vmem>>, vector<1x8xf32>
    %c42 = arith.constant 42 : index
    %c0_7 = arith.constant 0 : index
    %6 = vector.load %arg2[%c42, %c0_7] : memref<48x128xf32, #tpu.memory_space<vmem>>, vector<1x3xf32>
    %cst = arith.constant dense<0.000000e+00> : vector<8x16xf32>
    %7 = tpu.matmul %0, %1, %cst {dimension_numbers = #tpu.dot_dimension_numbers<[1], [0], [0], [1], [0, 0, 1, 1], [], []>} : vector<8x16xf32>, vector<16x16xf32>, vector<8x16xf32> -> vector<8x16xf32>
    %8 = vector.broadcast %4 : vector<1x16xf32> to vector<8x16xf32>
    %9 = arith.addf %7, %8 : vector<8x16xf32>
    %cst_8 = arith.constant 0.000000e+00 : f32
    %10 = vector.broadcast %cst_8 : f32 to vector<8x16xf32>
    %11 = arith.maximumf %9, %10 : vector<8x16xf32>
    %cst_9 = arith.constant dense<0.000000e+00> : vector<8x8xf32>
    %12 = tpu.matmul %11, %2, %cst_9 {dimension_numbers = #tpu.dot_dimension_numbers<[1], [0], [0], [1], [0, 0, 1, 1], [], []>} : vector<8x16xf32>, vector<16x8xf32>, vector<8x8xf32> -> vector<8x8xf32>
    %13 = vector.broadcast %5 : vector<1x8xf32> to vector<8x8xf32>
    %14 = arith.addf %12, %13 : vector<8x8xf32>
    %cst_10 = arith.constant 0.000000e+00 : f32
    %15 = vector.broadcast %cst_10 : f32 to vector<8x8xf32>
    %16 = arith.maximumf %14, %15 : vector<8x8xf32>
    %cst_11 = arith.constant dense<0.000000e+00> : vector<8x3xf32>
    %17 = tpu.matmul %16, %3, %cst_11 {dimension_numbers = #tpu.dot_dimension_numbers<[1], [0], [0], [1], [0, 0, 1, 1], [], []>} : vector<8x8xf32>, vector<8x3xf32>, vector<8x3xf32> -> vector<8x3xf32>
    %18 = vector.broadcast %6 : vector<1x3xf32> to vector<8x3xf32>
    %19 = arith.addf %17, %18 : vector<8x3xf32>
    %c0_12 = arith.constant 0 : index
    %c0_13 = arith.constant 0 : index
    %20 = vector.load %arg3[%c0_12, %c0_13] : memref<8x3xf32, #tpu.memory_space<vmem>>, vector<8x3xf32>
    tpu.vector_store %arg3[%c0_12, %c0_13], %19 {strides = array<i32>} : memref<8x3xf32, #tpu.memory_space<vmem>>, vector<8x3xf32>,
    return
  }
  func.func @transform_0(%arg0: i32) -> (i32, i32) {
    %c0_i32 = arith.constant 0 : i32
    %c0_i32_0 = arith.constant 0 : i32
    return %arg0, %c0_i32 : i32, i32
  }
  func.func @transform_1(%arg0: i32) -> (i32, i32) {
    %c0_i32 = arith.constant 0 : i32
    %c0_i32_0 = arith.constant 0 : i32
    %c0_i32_1 = arith.constant 0 : i32
    return %c0_i32, %c0_i32_0 : i32, i32
  }
  func.func @transform_2(%arg0: i32) -> (i32, i32) {
    %c0_i32 = arith.constant 0 : i32
    %c0_i32_0 = arith.constant 0 : i32
    return %arg0, %c0_i32 : i32, i32
  }
}

</mosaic_0001>

<bundles_post_ra>
// kernel: neural_net_forward.1
= control target key start
LH: loop header
LB: loop body
LE: loop exit
PB: predicated region body
PF: predicated region fallthrough
CT: control target
= control target key end

     0   :  { %v303_v0 = vmov 0.0|0.0   ;;  %vm304_vm0 = vmmov 0   ;;  %v305_v3 = vmov 0.0   ;;  %vm24_vm1 = vcmask 130048   ;;  %s351_s1 = inlined_call_operand.vmem [shape: f32[48,128], index: 1, kind: input, shape index: {}]   ;;  %s352_s0 = inlined_call_operand.vmem [shape: f32[8,16], index: 0, kind: input, shape index: {}]   ;;  %s353_s2 = inlined_call_operand.vmem [shape: f32[8,3], index: 2, kind: output, shape index: {}]  }
   0x1   :  { %294 = vmatprep.subr.bf16.mxu0 %v303_v0  ;;  %v12_v1 = vld [vmem:[%s351_s1] sm:$0xff]  ;;  %v13_v2 = vld [vmem:[%s351_s1 + $0x8] sm:$0xff]  ;;  %279 = vmatprep.mubr.msk.f32.mxu0 %vm304_vm0, %v305_v3  ;;  %v14_v6 = vld [vmem:[%s351_s1 + $0x10] sm:$0xff]  ;;  %vm181_vm2 = vcmask 64512   ;;  %vm255_vm3 = vcmask 23552  }
   0x2   :  { %v295_v4 = vpack.c.bf16 %v13_v2, %v12_v1  ;;  %297 = vmatprep.subr.bf16.mxu1 %v303_v0  ;;  %286 = vmatprep.mubr.msk.f32.mxu1 %vm304_vm0, %v305_v3  ;;  %v11_v5 = vld [vmem:[%s352_s0] sm:$0xff]  ;;  %v15_v7 = vld [vmem:[%s351_s1 + $0x18] sm:$0xff]  ;;  %v261_v9 = vld [vmem:[%s351_s1 + $0x28] ss:$0 sm:$0xff] }
   0x3   :  { %v298_v8 = vpack.c.bf16 %v15_v7, %v14_v6  ;;  %v16_v14 = vld [vmem:[%s351_s1 + $0x20] sm:$0xff]  ;;  %v263_v15 = vld [vmem:[%s351_s1 + $0x29] ss:$0 sm:$0xff]  ;;  %v265_v20 = vld [vmem:[%s351_s1 + $0x2a] ss:$0 sm:$0xff] }
   0x4   :  { %296 = vmatpush3.bf16.msra.mxu0 %v295_v4 }
   0x5   :  { %289 = vmatprep.subr.mxu0 %v305_v3  ;;  %299 = vmatpush3.bf16.msra.mxu1 %v298_v8 }
   0x7   :  { %280 = vmatmul.mubr.msk.f32.vlgmr.msra.gmra.mrb[0].mxu0 %vm24_vm1, %v11_v5 }
   0x8   :  { %291 = vmatprep.mubr.msk.f32.mxu0 %vm304_vm0, %v305_v3  ;;  %290 = vmatpush3.msra.mxu0 %v16_v14 }
  0xda   :  { %v94_v10 = vpop.f32.mrb[0].mxu0 }
  0xdb   :  { %v95_v11 = vadd.f32 %v261_v9, %v94_v10  ;;  %v281_v12 = vpop.f32.mrb[1].mxu0 }
  0xdd   :  { %v98_v13 = vmax.f32 %v95_v11, 0.0 }
  0xdf   :  { %287 = vmatmul.mubr.msk.f32.vlgmr.msra.gmra.mrb[0].mxu1 %vm24_vm1, %v98_v13 }
 0x1b2   :  { %v172_v16 = vpop.f32.mrb[0].mxu1 }
 0x1b3   :  { %v173_v17 = vadd.f32 %v263_v15, %v172_v16  ;;  %v288_v18 = vpop.f32.mrb[1].mxu1 }
 0x1b5   :  { %v176_v19 = vmax.f32 %v173_v17, 0.0 }
 0x1b7   :  { %292 = vmatmul.mubr.msk.f32.vlgmr.msra.gmra.mrb[2].mxu0 %vm181_vm2, %v176_v19 }
 0x28a   :  { %v251_v21 = vpop.f32.mrb[2].mxu0 }
 0x28b   :  { %v252_v22 = vadd.f32 %v265_v20, %v251_v21  ;;  %v293_v23 = vpop.f32.mrb[3].mxu0 }
 0x28d   :  { %256 = vst.msk [vmem:[%s353_s2] sm:$0xff] %vm255_vm3, %v252_v22 }

</bundles_post_ra>
